<compile_context>
chip_gen: v7x
topology: tpu7x:2x2x1
jax: 0.10.0
libtpu: 0.0.40
codegen_flags: <defaults>
</compile_context>

<pallas_src>
import functools

import jax
import jax.numpy as jnp
from jax.experimental import pallas as pl
from jax.experimental.pallas import tpu as pltpu

LANE = 128
SUBLANE = 8


def _round_up(x, m):
    return ((x + m - 1) // m) * m


def _bf16_tanh_ok():
    # bf16 EUP/VPU path exists on v6e/v7x; keep f32 tanh on older chips.
    try:
        kind = jax.devices()[0].device_kind.lower()
        return not any(tag in kind for tag in ("v2", "v3", "v4", "v5"))
    except Exception:
        return False


# ----------------------------------------------------------------------------
# Pallas kernel: fused pooler-dense + tanh + folded classifier head + sigmoid
# ----------------------------------------------------------------------------
def fused_head_kernel(x_ref,      # [bB, H]   bf16  pre-pooler features
                      wp_ref,     # [H, H]    bf16  pooler dense weight
                      bp_ref,     # [1, H]    f32   pooler dense bias
                      wf_ref,     # [H, Lp]   bf16  folded head weight (lane-padded)
                      bf_ref,     # [1, Lp]   f32   folded head bias (lane-padded)
                      out_ref,    # [bB, Lp]  f32   probabilities (lane-padded)
                      *, bf16_tanh):
    x = x_ref[...]                                                    # bf16

    # BERT pooler stand-in: tanh(x @ wp + bp), f32 accumulate on the MXU.
    h = jnp.dot(x, wp_ref[...], preferred_element_type=jnp.float32) + bp_ref[...]
    if bf16_tanh:
        h = jnp.tanh(h.astype(jnp.bfloat16))      # bf16 EUP, feeds MXU directly
    else:
        h = jnp.tanh(h).astype(jnp.bfloat16)      # v5e: f32 tanh, then narrow

    # Folded classifier head (Linear38 -> Dropout(eval) -> Linear8 -> Linear3
    # -> LinearOutput), one lane-dense MXU pass.
    logits = jnp.dot(h, wf_ref[...], preferred_element_type=jnp.float32) + bf_ref[...]

    out_ref[...] = jax.nn.sigmoid(logits).astype(out_ref.dtype)


def fused_head(x_bf16, params, num_labels, *, block_b_cap=1024):
    """x_bf16: [B, H] bfloat16 pre-pooler features -> [B, num_labels] f32 probs."""
    B, H = x_bf16.shape
    wp = params["wp_bf16"]
    bp = params["bp"]
    wf = params["w_fold_bf16"]
    bf = params["b_fold_pad"]
    Lp = wf.shape[1]                               # lane-padded output width (128)

    # Batch tile: aim for >=2 grid steps (keeps both v7x TensorCores busy and
    # gives the pipeline something to overlap), capped for VMEM headroom.
    bB = min(block_b_cap, max(SUBLANE, _round_up(pl.cdiv(B, 2), SUBLANE)))
    B_pad = _round_up(B, bB)
    if B_pad != B:
        # Only for batches that aren't a multiple of the tile; keeps every
        # block fully (8,128)-aligned.
        x_bf16 = jnp.pad(x_bf16, ((0, B_pad - B), (0, 0)))
    grid = (B_pad // bB,)

    kernel = functools.partial(fused_head_kernel, bf16_tanh=_bf16_tanh_ok())

    def vmem_bytes(wbuf):
        # x and out double-buffered by the pipeline; weights wbuf-buffered.
        return (2 * bB * H * 2 + 2 * bB * Lp * 4
                + wbuf * (H * H * 2 + H * Lp * 2 + H * 4 + Lp * 4))

    cost = pl.CostEstimate(
        flops=2 * B_pad * H * H + 2 * B_pad * H * Lp,
        transcendentals=B_pad * H + B_pad * Lp,
        bytes_accessed=(B_pad * H * 2 + H * H * 2 + H * Lp * 2
                        + (H + Lp) * 4 + B_pad * Lp * 4),
    )

    def run(single_buffer_weights):
        if single_buffer_weights:
            # Constant index_map -> block never changes; single buffer halves
            # the resident VMEM so it can be spent on bigger batch tiles.
            def wspec(shape):
                return pl.BlockSpec(shape, lambda i: (0, 0),
                                    pipeline_mode=pl.Buffered(1))
            wbuf = 1
        else:
            def wspec(shape):
                return pl.BlockSpec(shape, lambda i: (0, 0))
            wbuf = 2

        vlimit = int(min(64 * 2**20, max(32 * 2**20, 1.5 * vmem_bytes(wbuf))))

        return pl.pallas_call(
            kernel,
            out_shape=jax.ShapeDtypeStruct((B_pad, Lp), jnp.float32),
            grid_spec=pltpu.PrefetchScalarGridSpec(
                num_scalar_prefetch=0,
                grid=grid,
                in_specs=[
                    pl.BlockSpec((bB, H), lambda i: (i, 0)),   # x: batch-tiled
                    wspec((H, H)),                             # wp
                    wspec((1, H)),                             # bp
                    wspec((H, Lp)),                            # w_fold
                    wspec((1, Lp)),                            # b_fold
                ],
                out_specs=pl.BlockSpec((bB, Lp), lambda i: (i, 0)),
            ),
            compiler_params=pltpu.CompilerParams(
                dimension_semantics=("parallel",),             # shard across TCs
                vmem_limit_bytes=vlimit,                       # matters on v5e
            ),
            cost_estimate=cost,
        )(x_bf16, wp, bp, wf, bf)

    try:
        out = run(True)
    except Exception:
        # pipeline_mode=pl.Buffered(1) not supported by this build; fall back
        # to default double-buffered weight blocks (numerically identical).
        out = run(False)

    return out[:B, :num_labels]


# ----------------------------------------------------------------------------
# Deterministic parameter construction (synthetic; no checkpoint load)
# ----------------------------------------------------------------------------
def make_params(key, hidden_size, num_labels, vocab_size):
    ks = jax.random.split(key, 11)

    def lin(kw, kb, fan_in, fan_out):
        # Stored in [in, out] layout for lane-dense matmuls; biases [1, out].
        w = jax.random.normal(kw, (fan_in, fan_out), jnp.float32) / jnp.sqrt(fan_in)
        b = jax.random.normal(kb, (1, fan_out), jnp.float32) * 0.05
        return w, b

    w38, b38 = lin(ks[0], ks[1], hidden_size, 38)
    w8, b8 = lin(ks[2], ks[3], 38, 8)
    w3, b3 = lin(ks[4], ks[5], 8, 3)
    wo, bo = lin(ks[6], ks[7], 3, num_labels)

    emb = jax.random.normal(ks[8], (vocab_size, hidden_size), jnp.float32) * 0.02
    wp, bp = lin(ks[9], ks[10], hidden_size, hidden_size)

    # Eval-mode fold (Dropout(0.2) is identity at inference; NOT valid for training):
    #   y = (((x@w38+b38)@w8+b8)@w3+b3)@wo+bo == x @ w_fold + b_fold
    w_fold = w38 @ w8 @ w3 @ wo                                    # [H, L]
    b_fold = ((b38 @ w8 + b8) @ w3 + b3) @ wo + bo                 # [1, L]

    # Zero-pad head output to a lane-dense width so the kernel's stores are
    # full 128-lane `vst` instead of masked partial stores.
    Lp = max(LANE, _round_up(num_labels, LANE))
    w_fold_p = jnp.zeros((hidden_size, Lp), jnp.float32).at[:, :num_labels].set(w_fold)
    b_fold_p = jnp.zeros((1, Lp), jnp.float32).at[:, :num_labels].set(b_fold)

    return {
        # f32 originals (reference path)
        "w38": w38, "b38": b38, "w8": w8, "b8": b8,
        "w3": w3, "b3": b3, "wo": wo, "bo": bo,
        "wp": wp, "bp": bp, "emb": emb,
        # kernel-side params (bf16 weights, f32 biases, lane-padded head)
        "wp_bf16": wp.astype(jnp.bfloat16),
        "w_fold_bf16": w_fold_p.astype(jnp.bfloat16),
        "b_fold_pad": b_fold_p,
    }


def bert_features_stub(input_ids, attention_mask, params):
    """Plain-JAX stand-in for the BERT backbone up to (but not including) the
    pooler dense: embedding lookup + masked mean pool.  Emits bf16 so the
    kernel's x read is 2 B/elem with no extra wrapper-side cast pass."""
    # TODO(synk): full BERT encoder (multi-head attention layers) not implemented.
    emb = params["emb"][input_ids]                                    # [B, S, H]
    mask = attention_mask.astype(jnp.float32)[..., None]              # [B, S, 1]
    feats = (emb * mask).sum(axis=1) / jnp.maximum(mask.sum(axis=1), 1.0)
    return feats.astype(jnp.bfloat16)                                 # [B, H] bf16


# ----------------------------------------------------------------------------
def forward(input_ids, attention_mask, params, num_labels):
    feats = bert_features_stub(input_ids, attention_mask, params)
    return fused_head(feats, params, num_labels)


if __name__ == "__main__":
    B, S, H = 2, 8, 32
    VOCAB = 100
    NUM_LABELS = 4

    key = jax.random.PRNGKey(0)
    k_param, k_ids = jax.random.split(key)

    params = make_params(k_param, hidden_size=H, num_labels=NUM_LABELS, vocab_size=VOCAB)

    input_ids = jax.random.randint(k_ids, (B, S), 0, VOCAB, dtype=jnp.int32)
    attention_mask = jnp.ones((B, S), dtype=jnp.int32).at[:, S - 2:].set(0)

    probs = forward(input_ids, attention_mask, params, NUM_LABELS)
    probs = jax.block_until_ready(probs)

    # Reference check (pure JAX, f32, unfolded chain, Dropout=identity) —
    # validates the algebraic fold, the lane padding, and the fused kernel.
    # Tolerance covers the bf16 weight/activation path inside the kernel.
    pre = bert_features_stub(input_ids, attention_mask, params).astype(jnp.float32)
    pooled = jnp.tanh(pre @ params["wp"] + params["bp"])
    h = pooled @ params["w38"] + params["b38"]
    h = h @ params["w8"] + params["b8"]
    h = h @ params["w3"] + params["b3"]
    ref = jax.nn.sigmoid(h @ params["wo"] + params["bo"])

    assert probs.shape == (B, NUM_LABELS)
    assert jnp.allclose(probs, ref, atol=2e-2), "mismatch vs JAX reference"

    print("KERNEL_OK")
</pallas_src>

<mosaic_0001>
module attributes {stable_mosaic.version = 11 : i64} {
  func.func @fused_head_kernel(%arg0: i32, %arg1: memref<8x32xbf16, #tpu.memory_space<vmem>>, %arg2: memref<32x32xbf16, #tpu.memory_space<vmem>>, %arg3: memref<1x32xf32, #tpu.memory_space<vmem>>, %arg4: memref<32x128xbf16, #tpu.memory_space<vmem>>, %arg5: memref<1x128xf32, #tpu.memory_space<vmem>>, %arg6: memref<8x128xf32, #tpu.memory_space<vmem>>) attributes {dimension_semantics = [#tpu.dimension_semantics<parallel>], iteration_bounds = array<i64: 1>, scalar_prefetch = 0 : i64, scratch_operands = 0 : i64, tpu.core_type = #tpu.core_type<tc>, window_params = [{transform_indices = @transform_0, window_bounds = array<i64: 8, 32>}, {pipeline_mode = #tpu.pipeline_mode<synchronous>, transform_indices = @transform_1, window_bounds = array<i64: 32, 32>}, {pipeline_mode = #tpu.pipeline_mode<synchronous>, transform_indices = @transform_2, window_bounds = array<i64: 1, 32>}, {pipeline_mode = #tpu.pipeline_mode<synchronous>, transform_indices = @transform_3, window_bounds = array<i64: 32, 128>}, {pipeline_mode = #tpu.pipeline_mode<synchronous>, transform_indices = @transform_4, window_bounds = array<i64: 1, 128>}, {transform_indices = @transform_5, window_bounds = array<i64: 8, 128>}]} {
    %c0 = arith.constant 0 : index
    %c0_0 = arith.constant 0 : index
    %0 = vector.load %arg1[%c0, %c0_0] : memref<8x32xbf16, #tpu.memory_space<vmem>>, vector<8x32xbf16>
    %c0_1 = arith.constant 0 : index
    %c0_2 = arith.constant 0 : index
    %1 = vector.load %arg2[%c0_1, %c0_2] : memref<32x32xbf16, #tpu.memory_space<vmem>>, vector<32x32xbf16>
    %cst = arith.constant dense<0.000000e+00> : vector<8x32xf32>
    %2 = tpu.matmul %0, %1, %cst {dimension_numbers = #tpu.dot_dimension_numbers<[1], [0], [0], [1], [0, 0, 1, 1], [], []>} : vector<8x32xbf16>, vector<32x32xbf16>, vector<8x32xf32> -> vector<8x32xf32>
    %c0_3 = arith.constant 0 : index
    %c0_4 = arith.constant 0 : index
    %3 = vector.load %arg3[%c0_3, %c0_4] : memref<1x32xf32, #tpu.memory_space<vmem>>, vector<1x32xf32>
    %4 = vector.broadcast %3 : vector<1x32xf32> to vector<8x32xf32>
    %5 = arith.addf %2, %4 : vector<8x32xf32>
    %6 = arith.truncf %5 : vector<8x32xf32> to vector<8x32xbf16>
    %7 = math.tanh %6 : vector<8x32xbf16>
    %c0_5 = arith.constant 0 : index
    %c0_6 = arith.constant 0 : index
    %8 = vector.load %arg4[%c0_5, %c0_6] : memref<32x128xbf16, #tpu.memory_space<vmem>>, vector<32x128xbf16>
    %cst_7 = arith.constant dense<0.000000e+00> : vector<8x128xf32>
    %9 = tpu.matmul %7, %8, %cst_7 {dimension_numbers = #tpu.dot_dimension_numbers<[1], [0], [0], [1], [0, 0, 1, 1], [], []>} : vector<8x32xbf16>, vector<32x128xbf16>, vector<8x128xf32> -> vector<8x128xf32>
    %c0_8 = arith.constant 0 : index
    %c0_9 = arith.constant 0 : index
    %10 = vector.load %arg5[%c0_8, %c0_9] : memref<1x128xf32, #tpu.memory_space<vmem>>, vector<1x128xf32>
    %11 = vector.broadcast %10 : vector<1x128xf32> to vector<8x128xf32>
    %12 = arith.addf %9, %11 : vector<8x128xf32>
    %13 = arith.negf %12 : vector<8x128xf32>
    %14 = math.exp %13 : vector<8x128xf32>
    %cst_10 = arith.constant 1.000000e+00 : f32
    %15 = vector.broadcast %cst_10 : f32 to vector<8x128xf32>
    %16 = arith.addf %15, %14 : vector<8x128xf32>
    %17 = arith.divf %15, %16 : vector<8x128xf32>
    %c0_11 = arith.constant 0 : index
    %c0_12 = arith.constant 0 : index
    %18 = vector.load %arg6[%c0_11, %c0_12] : memref<8x128xf32, #tpu.memory_space<vmem>>, vector<8x128xf32>
    tpu.vector_store %arg6[%c0_11, %c0_12], %17 {strides = array<i32>} : memref<8x128xf32, #tpu.memory_space<vmem>>, vector<8x128xf32>,
    return
  }
  func.func @transform_0(%arg0: i32) -> (i32, i32) {
    %c0_i32 = arith.constant 0 : i32
    %c0_i32_0 = arith.constant 0 : i32
    return %arg0, %c0_i32 : i32, i32
  }
  func.func @transform_1(%arg0: i32) -> (i32, i32) {
    %c0_i32 = arith.constant 0 : i32
    %c0_i32_0 = arith.constant 0 : i32
    %c0_i32_1 = arith.constant 0 : i32
    return %c0_i32, %c0_i32_0 : i32, i32
  }
  func.func @transform_2(%arg0: i32) -> (i32, i32) {
    %c0_i32 = arith.constant 0 : i32
    %c0_i32_0 = arith.constant 0 : i32
    %c0_i32_1 = arith.constant 0 : i32
    return %c0_i32, %c0_i32_0 : i32, i32
  }
  func.func @transform_3(%arg0: i32) -> (i32, i32) {
    %c0_i32 = arith.constant 0 : i32
    %c0_i32_0 = arith.constant 0 : i32
    %c0_i32_1 = arith.constant 0 : i32
    return %c0_i32, %c0_i32_0 : i32, i32
  }
  func.func @transform_4(%arg0: i32) -> (i32, i32) {
    %c0_i32 = arith.constant 0 : i32
    %c0_i32_0 = arith.constant 0 : i32
    %c0_i32_1 = arith.constant 0 : i32
    return %c0_i32, %c0_i32_0 : i32, i32
  }
  func.func @transform_5(%arg0: i32) -> (i32, i32) {
    %c0_i32 = arith.constant 0 : i32
    %c0_i32_0 = arith.constant 0 : i32
    return %arg0, %c0_i32 : i32, i32
  }
}

module attributes {stable_mosaic.version = 11 : i64} {
  func.func @fused_head_kernel(%arg0: i32, %arg1: memref<8x32xbf16, #tpu.memory_space<vmem>>, %arg2: memref<32x32xbf16, #tpu.memory_space<vmem>>, %arg3: memref<1x32xf32, #tpu.memory_space<vmem>>, %arg4: memref<32x128xbf16, #tpu.memory_space<vmem>>, %arg5: memref<1x128xf32, #tpu.memory_space<vmem>>, %arg6: memref<8x128xf32, #tpu.memory_space<vmem>>) attributes {dimension_semantics = [#tpu.dimension_semantics<parallel>], iteration_bounds = array<i64: 1>, scalar_prefetch = 0 : i64, scratch_operands = 0 : i64, tpu.core_type = #tpu.core_type<tc>, window_params = [{transform_indices = @transform_0, window_bounds = array<i64: 8, 32>}, {pipeline_mode = #tpu.pipeline_mode<synchronous>, transform_indices = @transform_1, window_bounds = array<i64: 32, 32>}, {pipeline_mode = #tpu.pipeline_mode<synchronous>, transform_indices = @transform_2, window_bounds = array<i64: 1, 32>}, {pipeline_mode = #tpu.pipeline_mode<synchronous>, transform_indices = @transform_3, window_bounds = array<i64: 32, 128>}, {pipeline_mode = #tpu.pipeline_mode<synchronous>, transform_indices = @transform_4, window_bounds = array<i64: 1, 128>}, {transform_indices = @transform_5, window_bounds = array<i64: 8, 128>}]} {
    %c0 = arith.constant 0 : index
    %c0_0 = arith.constant 0 : index
    %0 = vector.load %arg1[%c0, %c0_0] : memref<8x32xbf16, #tpu.memory_space<vmem>>, vector<8x32xbf16>
    %c0_1 = arith.constant 0 : index
    %c0_2 = arith.constant 0 : index
    %1 = vector.load %arg2[%c0_1, %c0_2] : memref<32x32xbf16, #tpu.memory_space<vmem>>, vector<32x32xbf16>
    %cst = arith.constant dense<0.000000e+00> : vector<8x32xf32>
    %2 = tpu.matmul %0, %1, %cst {dimension_numbers = #tpu.dot_dimension_numbers<[1], [0], [0], [1], [0, 0, 1, 1], [], []>} : vector<8x32xbf16>, vector<32x32xbf16>, vector<8x32xf32> -> vector<8x32xf32>
    %c0_3 = arith.constant 0 : index
    %c0_4 = arith.constant 0 : index
    %3 = vector.load %arg3[%c0_3, %c0_4] : memref<1x32xf32, #tpu.memory_space<vmem>>, vector<1x32xf32>
    %4 = vector.broadcast %3 : vector<1x32xf32> to vector<8x32xf32>
    %5 = arith.addf %2, %4 : vector<8x32xf32>
    %6 = arith.truncf %5 : vector<8x32xf32> to vector<8x32xbf16>
    %7 = math.tanh %6 : vector<8x32xbf16>
    %c0_5 = arith.constant 0 : index
    %c0_6 = arith.constant 0 : index
    %8 = vector.load %arg4[%c0_5, %c0_6] : memref<32x128xbf16, #tpu.memory_space<vmem>>, vector<32x128xbf16>
    %cst_7 = arith.constant dense<0.000000e+00> : vector<8x128xf32>
    %9 = tpu.matmul %7, %8, %cst_7 {dimension_numbers = #tpu.dot_dimension_numbers<[1], [0], [0], [1], [0, 0, 1, 1], [], []>} : vector<8x32xbf16>, vector<32x128xbf16>, vector<8x128xf32> -> vector<8x128xf32>
    %c0_8 = arith.constant 0 : index
    %c0_9 = arith.constant 0 : index
    %10 = vector.load %arg5[%c0_8, %c0_9] : memref<1x128xf32, #tpu.memory_space<vmem>>, vector<1x128xf32>
    %11 = vector.broadcast %10 : vector<1x128xf32> to vector<8x128xf32>
    %12 = arith.addf %9, %11 : vector<8x128xf32>
    %13 = arith.negf %12 : vector<8x128xf32>
    %14 = math.exp %13 : vector<8x128xf32>
    %cst_10 = arith.constant 1.000000e+00 : f32
    %15 = vector.broadcast %cst_10 : f32 to vector<8x128xf32>
    %16 = arith.addf %15, %14 : vector<8x128xf32>
    %17 = arith.divf %15, %16 : vector<8x128xf32>
    %c0_11 = arith.constant 0 : index
    %c0_12 = arith.constant 0 : index
    %18 = vector.load %arg6[%c0_11, %c0_12] : memref<8x128xf32, #tpu.memory_space<vmem>>, vector<8x128xf32>
    tpu.vector_store %arg6[%c0_11, %c0_12], %17 {strides = array<i32>} : memref<8x128xf32, #tpu.memory_space<vmem>>, vector<8x128xf32>,
    return
  }
  func.func @transform_0(%arg0: i32) -> (i32, i32) {
    %c0_i32 = arith.constant 0 : i32
    %c0_i32_0 = arith.constant 0 : i32
    return %arg0, %c0_i32 : i32, i32
  }
  func.func @transform_1(%arg0: i32) -> (i32, i32) {
    %c0_i32 = arith.constant 0 : i32
    %c0_i32_0 = arith.constant 0 : i32
    %c0_i32_1 = arith.constant 0 : i32
    return %c0_i32, %c0_i32_0 : i32, i32
  }
  func.func @transform_2(%arg0: i32) -> (i32, i32) {
    %c0_i32 = arith.constant 0 : i32
    %c0_i32_0 = arith.constant 0 : i32
    %c0_i32_1 = arith.constant 0 : i32
    return %c0_i32, %c0_i32_0 : i32, i32
  }
  func.func @transform_3(%arg0: i32) -> (i32, i32) {
    %c0_i32 = arith.constant 0 : i32
    %c0_i32_0 = arith.constant 0 : i32
    %c0_i32_1 = arith.constant 0 : i32
    return %c0_i32, %c0_i32_0 : i32, i32
  }
  func.func @transform_4(%arg0: i32) -> (i32, i32) {
    %c0_i32 = arith.constant 0 : i32
    %c0_i32_0 = arith.constant 0 : i32
    %c0_i32_1 = arith.constant 0 : i32
    return %c0_i32, %c0_i32_0 : i32, i32
  }
  func.func @transform_5(%arg0: i32) -> (i32, i32) {
    %c0_i32 = arith.constant 0 : i32
    %c0_i32_0 = arith.constant 0 : i32
    return %arg0, %c0_i32 : i32, i32
  }
}

</mosaic_0001>

<bundles_post_ra>
// kernel: tpu_custom_call.1
= control target key start
LH: loop header
LB: loop body
LE: loop exit
PB: predicated region body
PF: predicated region fallthrough
CT: control target
= control target key end

     0   :  { %10 = vsyncpa [#allocation3], 0  ;;  %s463_s0 = inlined_call_operand.hbm [shape: bf16[8,32], index: 0, kind: input, shape index: {}]   ;;  %s464_s1 = inlined_call_operand.hbm [shape: bf16[32,32], index: 1, kind: input, shape index: {}]   ;;  %s465_s2 = inlined_call_operand.vmem [shape: f32[1,32], index: 2, kind: input, shape index: {}]   ;;  %s466_s3 = inlined_call_operand.hbm [shape: bf16[32,128], index: 3, kind: input, shape index: {}]   ;;  %s467_s4 = inlined_call_operand.vmem [shape: f32[1,128], index: 4, kind: input, shape index: {}]   ;;  %s468_s5 = inlined_call_operand.hbm [shape: f32[8,128], index: 5, kind: output, shape index: {}]  }
   0x1   :  { %11 = vsyncpa [#allocation6], 0 }
   0x2   :  { %12 = vsyncpa [#allocation4], 0  ;;  %s363_s18 = smov [#allocation5]   ;;  %s269_s22 = scalar_lea.hbm %s464_s1, 256 }
   0x3   :  { %s28_s19 = sshll.u32 %s363_s18, 4  ;;  %p270_p0 = scmp.ne.s32.totalorder %s464_s1, %s269_s22  ;;  %s29_s19 = int_to_ptr.vmem [resolvable:$true] %s28_s19 }
   0x4   :  { %p273_p1 = scmp.lt.u32.totalorder %s269_s22, %s464_s1 }
   0x6   :  { %p275_p2 = pnand %p273_p1, %p270_p0 }
   0x8   :  { %278 = shalt.err (!%p275_p2)
}
   0x9   :  { %s279_s27 = scalar_lea.vmem %s29_s19, 256  ;;  %p284_p4 = scmp.lt.s32.totalorder %s29_s19, %s29_s19 }
   0xa   :  { %p280_p3 = scmp.ne.s32.totalorder %s29_s19, %s279_s27  ;;  %p285_p5 = scmp.lt.s32.totalorder %s279_s27, %s279_s27 }
   0xc   :  { %p286_p6 = por %p285_p5, %p284_p4 }
   0xe   :  { %p287_p7 = pnand %p286_p6, %p280_p3 }
  0x10   :  { %290 = shalt.err (!%p287_p7)
}
  0x11   :  { %s364_s28 = smov 64   ;;  %s365_s29 = smov 4  }
  0x12   :  { %34 = dma.hbm_to_vmem [thread:$0]  %s464_s1, 256, %s29_s19, [#allocation6], %s364_s28, %s364_s28, %s365_s29  }
  0x13   :  { %s366_s7 = smov [#allocation2]   ;;  %s367_s9 = smov [#allocation7]  }
  0x14   :  { %s19_s8 = sshll.u32 %s366_s7, 4  ;;  %s42_s10 = sshll.u32 %s367_s9, 4  ;;  %s20_s8 = int_to_ptr.vmem [resolvable:$true] %s19_s8  ;;  %s43_s10 = int_to_ptr.vmem [resolvable:$true] %s42_s10 }
  0x15   :  { %s291_s13 = scalar_lea.hbm %s463_s0, 64 }
  0x16   :  { %p292_p8 = scmp.ne.s32.totalorder %s463_s0, %s291_s13  ;;  %p295_p9 = scmp.lt.u32.totalorder %s291_s13, %s463_s0 }
  0x18   :  { %p297_p10 = pnand %p295_p9, %p292_p8 }
  0x1a   :  { %300 = shalt.err (!%p297_p10)
}
  0x1b   :  { %s301_s1 = scalar_lea.vmem %s20_s8, 64  ;;  %p306_p12 = scmp.lt.s32.totalorder %s20_s8, %s20_s8 }
  0x1c   :  { %p302_p11 = scmp.ne.s32.totalorder %s20_s8, %s301_s1  ;;  %p307_p13 = scmp.lt.s32.totalorder %s301_s1, %s301_s1 }
  0x1e   :  { %p308_p0 = por %p307_p13, %p306_p12 }
  0x20   :  { %p309_p1 = pnand %p308_p0, %p302_p11 }
  0x22   :  { %312 = shalt.err (!%p309_p1)
}
  0x23   :  { %22 = dma.hbm_to_vmem [thread:$0]  %s463_s0, 64, %s20_s8, [#allocation3]  }
  0x24   :  { %s313_s22 = scalar_lea.hbm %s466_s3, 256 }
  0x25   :  { %p314_p2 = scmp.ne.s32.totalorder %s466_s3, %s313_s22  ;;  %p317_p3 = scmp.lt.u32.totalorder %s313_s22, %s466_s3 }
  0x27   :  { %p319_p4 = pnand %p317_p3, %p314_p2 }
  0x29   :  { %322 = shalt.err (!%p319_p4)
}
  0x2a   :  { %s323_s27 = scalar_lea.vmem %s43_s10, 256  ;;  %p328_p6 = scmp.lt.s32.totalorder %s43_s10, %s43_s10 }
  0x2b   :  { %p324_p5 = scmp.ne.s32.totalorder %s43_s10, %s323_s27  ;;  %p329_p7 = scmp.lt.s32.totalorder %s323_s27, %s323_s27 }
  0x2d   :  { %p330_p8 = por %p329_p7, %p328_p6 }
  0x2f   :  { %p331_p9 = pnand %p330_p8, %p324_p5 }
  0x31   :  { %334 = shalt.err (!%p331_p9)
}
  0x32   :  { %48 = dma.hbm_to_vmem [thread:$0]  %s466_s3, 256, %s43_s10, [#allocation6], %s364_s28, %s364_s28, %s365_s29  }
  0x33   :  { %357 = dma.done.wait [#allocation3], 64  }
  0x34   :  { %358 = vsyncadd [#allocation3], 4294967232 }
  0x35   :  { %359 = dma.done.wait [#allocation6], 512  }
  0x36   :  { %360 = vsyncadd [#allocation6], 4294966784  ;;  %v368_v0 = vmov 0.0   ;;  %vm369_vm0 = vmmov 0   ;;  %v259_v1 = vld [vmem:[#allocation5] sm:$0xff]   ;;  %v260_v2 = vld [vmem:[#allocation5 + $0x8] sm:$0xff]  }
  0x37   :  { %235 = vmatprep.subr.bf16.mxu0 %v368_v0  ;;  %239 = vmatprep.mubr.msk.bf16.mxu0 %vm369_vm0, %v368_v0  ;;  %v61_v3 = vld [vmem:[#allocation2] sm:$0xf]  ;;  %vm85_vm1 = vcmask 261120   ;;  %v261_v4 = vld [vmem:[#allocation7] sm:$0xff]  }
  0x38   :  { %243 = vmatprep.subr.bf16.mxu1 %v368_v0  ;;  %247 = vmatprep.mubr.msk.bf16.mxu1 %vm369_vm0, %v368_v0  ;;  %v262_v5 = vld [vmem:[#allocation7 + $0x8] sm:$0xff]  }
  0x39   :  { %236 = vmatpush3.bf16.msra.mxu0 %v259_v1  ;;  %244 = vmatpush3.bf16.msra.mxu1 %v261_v4  ;;  %v220_v6 = vld [vmem:[%s465_s2] ss:$0 sm:$0xff]  ;;  %s370_s2 = smov [#allocation8]  }
  0x3a   :  { %237 = vmatprep.subr.bf16.mxu0 %v368_v0  ;;  %245 = vmatprep.subr.bf16.mxu1 %v368_v0  ;;  %v224_v14 = vld [vmem:[%s467_s4] ss:$0 sm:$0xff]  ;;  %s210_s7 = sshll.u32 %s370_s2, 4  ;;  %s211_s7 = int_to_ptr.vmem [resolvable:$true] %s210_s7 }
  0x3b   :  { %s335_s8 = scalar_lea.vmem %s211_s7, 128  ;;  %p340_p11 = scmp.lt.s32.totalorder %s211_s7, %s211_s7 }
  0x3c   :  { %p336_p10 = scmp.ne.s32.totalorder %s211_s7, %s335_s8  ;;  %p341_p12 = scmp.lt.s32.totalorder %s335_s8, %s335_s8 }
  0x3d   :  { %238 = vmatpush3.bf16.msra.mxu0 %v260_v2  ;;  %246 = vmatpush3.bf16.msra.mxu1 %v262_v5 }
  0x3e   :  { %p342_p13 = por %p341_p12, %p340_p11 }
  0x40   :  { %240 = vmatmul.mubr.msk.bf16.vlgmr.msra.gmra.mrb[0].mxu0 %vm85_vm1, %v61_v3  ;;  %p343_p0 = pnand %p342_p13, %p336_p10 }
 0x113   :  { %v123_v7 = vpop.f32.mrb[0].mxu0 }
 0x114   :  { %v124_v8 = vadd.f32 %v220_v6, %v123_v7  ;;  %v241_v9 = vpop.f32.mrb[1].mxu0 }
 0x115   :  { %v126_v10 = vpop.f32.mrb[2].mxu0 }
 0x116   :  { %v129_v11 = vpack.c.bf16 %v124_v8, %v124_v8  ;;  %v242_v12 = vpop.f32.mrb[3].mxu0 }
 0x118   :  { %263 = vtanh.bf16 %v129_v11 }
 0x123   :  { %v264_v13 = vpop.eup %263 }
 0x124   :  { %248 = vmatmul.mubr.msk.bf16.vlgmr.msra.gmra.mrb[0].mxu1 %vm85_vm1, %v264_v13 }
 0x1f7   :  { %v191_v15 = vpop.f32.mrb[0].mxu1 }
 0x1f8   :  { %v192_v16 = vadd.f32 %v224_v14, %v191_v15  ;;  %v249_v17 = vpop.f32.mrb[1].mxu1 }
 0x1f9   :  { %v194_v18 = vpop.f32.mrb[2].mxu1 }
 0x1fa   :  { %v228_v19 = vmul.f32 -1.442695, %v192_v16  ;;  %v250_v20 = vpop.f32.mrb[3].mxu1 }
 0x1fc   :  { %265 = vpow2.f32 %v228_v19 }
 0x206   :  { %v266_v21 = vpop.eup %265 }
 0x207   :  { %v200_v22 = vadd.f32 1.0, %v266_v21 }
 0x209   :  { %267 = vrcp.f32 %v200_v22 }
 0x213   :  { %v268_v23 = vpop.eup %267 }
 0x214   :  { %203 = vst [vmem:[#allocation8] sm:$0xff] %v268_v23 }
 0x215   :  { %346 = shalt.err (!%p343_p0)
}
 0x216   :  { %s347_s10 = scalar_lea.hbm %s468_s5, 128 }
 0x217   :  { %p348_p1 = scmp.ne.s32.totalorder %s468_s5, %s347_s10  ;;  %p351_p2 = scmp.lt.u32.totalorder %s347_s10, %s468_s5 }
 0x219   :  { %p353_p3 = pnand %p351_p2, %p348_p1 }
 0x21b   :  { %356 = shalt.err (!%p353_p3)
}
 0x21c   :  { %213 = dma.vmem_to_hbm [thread:$0]  %s211_s7, 128, %s468_s5, [#allocation4]  }
 0x21d   :  { %361 = dma.done.wait [#allocation4], 128  }
 0x21e   :  { %362 = vsyncadd [#allocation4], 4294967168 }
 0x21f   :  { %217 = vsyncpa [#allocation3], 1 }
 0x220   :  { %218 = vsyncpa [#allocation6], 1 }
 0x221   :  { %219 = vsyncpa [#allocation4], 1 }

// kernel: tpu_custom_call.1
= control target key start
LH: loop header
LB: loop body
LE: loop exit
PB: predicated region body
PF: predicated region fallthrough
CT: control target
= control target key end

     0   :  { %10 = vsyncpa [#allocation3], 0  ;;  %s463_s0 = inlined_call_operand.hbm [shape: bf16[8,32], index: 0, kind: input, shape index: {}]   ;;  %s464_s1 = inlined_call_operand.hbm [shape: bf16[32,32], index: 1, kind: input, shape index: {}]   ;;  %s465_s2 = inlined_call_operand.vmem [shape: f32[1,32], index: 2, kind: input, shape index: {}]   ;;  %s466_s3 = inlined_call_operand.hbm [shape: bf16[32,128], index: 3, kind: input, shape index: {}]   ;;  %s467_s4 = inlined_call_operand.vmem [shape: f32[1,128], index: 4, kind: input, shape index: {}]   ;;  %s468_s5 = inlined_call_operand.hbm [shape: f32[8,128], index: 5, kind: output, shape index: {}]  }
   0x1   :  { %11 = vsyncpa [#allocation6], 0 }
   0x2   :  { %12 = vsyncpa [#allocation4], 0  ;;  %s363_s18 = smov [#allocation5]   ;;  %s269_s22 = scalar_lea.hbm %s464_s1, 256 }
   0x3   :  { %s28_s19 = sshll.u32 %s363_s18, 4  ;;  %p270_p0 = scmp.ne.s32.totalorder %s464_s1, %s269_s22  ;;  %s29_s19 = int_to_ptr.vmem [resolvable:$true] %s28_s19 }
   0x4   :  { %p273_p1 = scmp.lt.u32.totalorder %s269_s22, %s464_s1 }
   0x6   :  { %p275_p2 = pnand %p273_p1, %p270_p0 }
   0x8   :  { %278 = shalt.err (!%p275_p2)
}
   0x9   :  { %s279_s27 = scalar_lea.vmem %s29_s19, 256  ;;  %p284_p4 = scmp.lt.s32.totalorder %s29_s19, %s29_s19 }
   0xa   :  { %p280_p3 = scmp.ne.s32.totalorder %s29_s19, %s279_s27  ;;  %p285_p5 = scmp.lt.s32.totalorder %s279_s27, %s279_s27 }
   0xc   :  { %p286_p6 = por %p285_p5, %p284_p4 }
   0xe   :  { %p287_p7 = pnand %p286_p6, %p280_p3 }
  0x10   :  { %290 = shalt.err (!%p287_p7)
}
  0x11   :  { %s364_s28 = smov 64   ;;  %s365_s29 = smov 4  }
  0x12   :  { %34 = dma.hbm_to_vmem [thread:$0]  %s464_s1, 256, %s29_s19, [#allocation6], %s364_s28, %s364_s28, %s365_s29  }
  0x13   :  { %s366_s7 = smov [#allocation2]   ;;  %s367_s9 = smov [#allocation7]  }
  0x14   :  { %s19_s8 = sshll.u32 %s366_s7, 4  ;;  %s42_s10 = sshll.u32 %s367_s9, 4  ;;  %s20_s8 = int_to_ptr.vmem [resolvable:$true] %s19_s8  ;;  %s43_s10 = int_to_ptr.vmem [resolvable:$true] %s42_s10 }
  0x15   :  { %s291_s13 = scalar_lea.hbm %s463_s0, 64 }
  0x16   :  { %p292_p8 = scmp.ne.s32.totalorder %s463_s0, %s291_s13  ;;  %p295_p9 = scmp.lt.u32.totalorder %s291_s13, %s463_s0 }
  0x18   :  { %p297_p10 = pnand %p295_p9, %p292_p8 }
  0x1a   :  { %300 = shalt.err (!%p297_p10)
}
  0x1b   :  { %s301_s1 = scalar_lea.vmem %s20_s8, 64  ;;  %p306_p12 = scmp.lt.s32.totalorder %s20_s8, %s20_s8 }
  0x1c   :  { %p302_p11 = scmp.ne.s32.totalorder %s20_s8, %s301_s1  ;;  %p307_p13 = scmp.lt.s32.totalorder %s301_s1, %s301_s1 }
  0x1e   :  { %p308_p0 = por %p307_p13, %p306_p12 }
  0x20   :  { %p309_p1 = pnand %p308_p0, %p302_p11 }
  0x22   :  { %312 = shalt.err (!%p309_p1)
}
  0x23   :  { %22 = dma.hbm_to_vmem [thread:$0]  %s463_s0, 64, %s20_s8, [#allocation3]  }
  0x24   :  { %s313_s22 = scalar_lea.hbm %s466_s3, 256 }
  0x25   :  { %p314_p2 = scmp.ne.s32.totalorder %s466_s3, %s313_s22  ;;  %p317_p3 = scmp.lt.u32.totalorder %s313_s22, %s466_s3 }
  0x27   :  { %p319_p4 = pnand %p317_p3, %p314_p2 }
  0x29   :  { %322 = shalt.err (!%p319_p4)
}
  0x2a   :  { %s323_s27 = scalar_lea.vmem %s43_s10, 256  ;;  %p328_p6 = scmp.lt.s32.totalorder %s43_s10, %s43_s10 }
  0x2b   :  { %p324_p5 = scmp.ne.s32.totalorder %s43_s10, %s323_s27  ;;  %p329_p7 = scmp.lt.s32.totalorder %s323_s27, %s323_s27 }
  0x2d   :  { %p330_p8 = por %p329_p7, %p328_p6 }
  0x2f   :  { %p331_p9 = pnand %p330_p8, %p324_p5 }
  0x31   :  { %334 = shalt.err (!%p331_p9)
}
  0x32   :  { %48 = dma.hbm_to_vmem [thread:$0]  %s466_s3, 256, %s43_s10, [#allocation6], %s364_s28, %s364_s28, %s365_s29  }
  0x33   :  { %357 = dma.done.wait [#allocation3], 64  }
  0x34   :  { %358 = vsyncadd [#allocation3], 4294967232 }
  0x35   :  { %359 = dma.done.wait [#allocation6], 512  }
  0x36   :  { %360 = vsyncadd [#allocation6], 4294966784  ;;  %v368_v0 = vmov 0.0   ;;  %vm369_vm0 = vmmov 0   ;;  %v259_v1 = vld [vmem:[#allocation5] sm:$0xff]   ;;  %v260_v2 = vld [vmem:[#allocation5 + $0x8] sm:$0xff]  }
  0x37   :  { %235 = vmatprep.subr.bf16.mxu0 %v368_v0  ;;  %239 = vmatprep.mubr.msk.bf16.mxu0 %vm369_vm0, %v368_v0  ;;  %v61_v3 = vld [vmem:[#allocation2] sm:$0xf]  ;;  %vm85_vm1 = vcmask 261120   ;;  %v261_v4 = vld [vmem:[#allocation7] sm:$0xff]  }
  0x38   :  { %243 = vmatprep.subr.bf16.mxu1 %v368_v0  ;;  %247 = vmatprep.mubr.msk.bf16.mxu1 %vm369_vm0, %v368_v0  ;;  %v262_v5 = vld [vmem:[#allocation7 + $0x8] sm:$0xff]  }
  0x39   :  { %236 = vmatpush3.bf16.msra.mxu0 %v259_v1  ;;  %244 = vmatpush3.bf16.msra.mxu1 %v261_v4  ;;  %v220_v6 = vld [vmem:[%s465_s2] ss:$0 sm:$0xff]  ;;  %s370_s2 = smov [#allocation8]  }
  0x3a   :  { %237 = vmatprep.subr.bf16.mxu0 %v368_v0  ;;  %245 = vmatprep.subr.bf16.mxu1 %v368_v0  ;;  %v224_v14 = vld [vmem:[%s467_s4] ss:$0 sm:$0xff]  ;;  %s210_s7 = sshll.u32 %s370_s2, 4  ;;  %s211_s7 = int_to_ptr.vmem [resolvable:$true] %s210_s7 }
  0x3b   :  { %s335_s8 = scalar_lea.vmem %s211_s7, 128  ;;  %p340_p11 = scmp.lt.s32.totalorder %s211_s7, %s211_s7 }
  0x3c   :  { %p336_p10 = scmp.ne.s32.totalorder %s211_s7, %s335_s8  ;;  %p341_p12 = scmp.lt.s32.totalorder %s335_s8, %s335_s8 }
  0x3d   :  { %238 = vmatpush3.bf16.msra.mxu0 %v260_v2  ;;  %246 = vmatpush3.bf16.msra.mxu1 %v262_v5 }
  0x3e   :  { %p342_p13 = por %p341_p12, %p340_p11 }
  0x40   :  { %240 = vmatmul.mubr.msk.bf16.vlgmr.msra.gmra.mrb[0].mxu0 %vm85_vm1, %v61_v3  ;;  %p343_p0 = pnand %p342_p13, %p336_p10 }
 0x113   :  { %v123_v7 = vpop.f32.mrb[0].mxu0 }
 0x114   :  { %v124_v8 = vadd.f32 %v220_v6, %v123_v7  ;;  %v241_v9 = vpop.f32.mrb[1].mxu0 }
 0x115   :  { %v126_v10 = vpop.f32.mrb[2].mxu0 }
 0x116   :  { %v129_v11 = vpack.c.bf16 %v124_v8, %v124_v8  ;;  %v242_v12 = vpop.f32.mrb[3].mxu0 }
 0x118   :  { %263 = vtanh.bf16 %v129_v11 }
 0x123   :  { %v264_v13 = vpop.eup %263 }
 0x124   :  { %248 = vmatmul.mubr.msk.bf16.vlgmr.msra.gmra.mrb[0].mxu1 %vm85_vm1, %v264_v13 }
 0x1f7   :  { %v191_v15 = vpop.f32.mrb[0].mxu1 }
 0x1f8   :  { %v192_v16 = vadd.f32 %v224_v14, %v191_v15  ;;  %v249_v17 = vpop.f32.mrb[1].mxu1 }
 0x1f9   :  { %v194_v18 = vpop.f32.mrb[2].mxu1 }
 0x1fa   :  { %v228_v19 = vmul.f32 -1.442695, %v192_v16  ;;  %v250_v20 = vpop.f32.mrb[3].mxu1 }
 0x1fc   :  { %265 = vpow2.f32 %v228_v19 }
 0x206   :  { %v266_v21 = vpop.eup %265 }
 0x207   :  { %v200_v22 = vadd.f32 1.0, %v266_v21 }
 0x209   :  { %267 = vrcp.f32 %v200_v22 }
 0x213   :  { %v268_v23 = vpop.eup %267 }
 0x214   :  { %203 = vst [vmem:[#allocation8] sm:$0xff] %v268_v23 }
 0x215   :  { %346 = shalt.err (!%p343_p0)
}
 0x216   :  { %s347_s10 = scalar_lea.hbm %s468_s5, 128 }
 0x217   :  { %p348_p1 = scmp.ne.s32.totalorder %s468_s5, %s347_s10  ;;  %p351_p2 = scmp.lt.u32.totalorder %s347_s10, %s468_s5 }
 0x219   :  { %p353_p3 = pnand %p351_p2, %p348_p1 }
 0x21b   :  { %356 = shalt.err (!%p353_p3)
}
 0x21c   :  { %213 = dma.vmem_to_hbm [thread:$0]  %s211_s7, 128, %s468_s5, [#allocation4]  }
 0x21d   :  { %361 = dma.done.wait [#allocation4], 128  }
 0x21e   :  { %362 = vsyncadd [#allocation4], 4294967168 }
 0x21f   :  { %217 = vsyncpa [#allocation3], 1 }
 0x220   :  { %218 = vsyncpa [#allocation6], 1 }
 0x221   :  { %219 = vsyncpa [#allocation4], 1 }

</bundles_post_ra>
